<compile_context>
chip_gen: v7x
topology: tpu7x:2x2x1
jax: 0.10.0
libtpu: 0.0.40
codegen_flags: <defaults>
</compile_context>

<pallas_src>
from functools import partial

import jax
import jax.numpy as jnp
from jax.experimental import pallas as pl
from jax.experimental.pallas import tpu as pltpu


# ---------------------------------------------------------------------------
# Fused Pallas kernel: bn2 shift + residual + ReLU + SE (pool, FCs, sigmoid,
# channel-wise rescale). bn2 scale is pre-folded into conv2's weights.
# ---------------------------------------------------------------------------
def _fused_bn_res_se_kernel(conv_ref, res_ref, shift_ref, w1_ref, w2_ref,
                            out_x_ref, y_ref):
    # bn2 shift + residual add + ReLU, staged through the output tile so the
    # compiler does not need a second activation-sized VMEM temp.
    out_x_ref[...] = jnp.maximum(
        conv_ref[...] + shift_ref[...][None, :, :] + res_ref[...], 0.0)

    # ---- SELayer ----
    # AdaptiveAvgPool2d(1): mean over the flattened spatial (lane) axis.
    pooled = jnp.mean(out_x_ref[...], axis=-1)              # (TB, C)
    # fc: Linear(C, C//r, bias=False) -> ReLU -> Linear(C//r, C, bias=False)
    h = jnp.maximum(
        jnp.dot(pooled, w1_ref[...], preferred_element_type=jnp.float32), 0.0)
    z = jnp.dot(h, w2_ref[...], preferred_element_type=jnp.float32)
    # Sigmoid (exact reciprocal).
    y = pl.reciprocal(1.0 + jnp.exp(-z), approx=False)      # (TB, C)

    y_ref[...] = y
    # x * y.view(b, c, 1, 1): broadcast the channel gate over the spatial axis.
    out_x_ref[...] = out_x_ref[...] * y[:, :, None]


def _vmem_budget():
    """Per-generation (activation-tile budget, vmem_limit_bytes)."""
    try:
        info = pltpu.get_tpu_info()
        cap = int(getattr(info, "vmem_capacity_bytes", 64 * 1024 * 1024))
    except Exception:  # pragma: no cover - conservative fallback (v7x-sized)
        cap = 64 * 1024 * 1024
    # v5e/v6e (128 MiB VMEM) -> 96 MiB limit / 48 MiB activation budget;
    # v7x (64 MiB VMEM)      -> 48 MiB limit / 24 MiB activation budget.
    vmem_limit = min(cap * 3 // 4, 96 * 1024 * 1024)
    return vmem_limit // 2, vmem_limit


def _choose_batch_tile(B, row_bytes, budget_bytes, max_batch_tile=None):
    """Largest batch tile whose double-buffered activation tiles fit the budget.

    3 activation-sized arrays (conv-in, residual-in, out-x staged through the
    output tile) x 2 for double buffering = 6 buffers.
    """
    tb = max(1, budget_bytes // (6 * row_bytes))
    if max_batch_tile is not None:
        tb = min(tb, max_batch_tile)
    # Guarantee >= 2 grid steps when the batch is big enough: with
    # dimension_semantics=("parallel",) that lets v7x shard across both
    # TensorCores; on 1-TC v5e/v6e the extra ~0.35us step is negligible.
    if B > 8:
        half = -(-B // 2)                     # ceil(B / 2)
        tb = min(tb, ((half + 7) // 8) * 8)
    if tb >= B:
        return B                              # whole batch in a single block
    # (8, 128) rule: TB sits on the sublane axis of the (TB, C) gate output,
    # so a partial batch tile must be a multiple of 8.
    return max(8, (tb // 8) * 8)


def fused_bn_res_relu_se(conv_out, residual, bn_shift, w1_t, w2_t,
                         *, max_batch_tile=None):
    """bn2-shift + residual-add + ReLU + SE gate, fused. f32, NCHW."""
    B, C, H, W = conv_out.shape
    HW = H * W
    Cr = w1_t.shape[1]

    act_budget, vmem_limit = _vmem_budget()
    tb = _choose_batch_tile(B, C * HW * 4, act_budget, max_batch_tile)

    conv3 = conv_out.reshape(B, C, HW)
    res3 = residual.reshape(B, C, HW)

    out_x3, y = pl.pallas_call(
        _fused_bn_res_se_kernel,
        grid=(pl.cdiv(B, tb),),
        in_specs=[
            pl.BlockSpec((tb, C, HW), lambda i: (i, 0, 0)),   # conv2 output
            pl.BlockSpec((tb, C, HW), lambda i: (i, 0, 0)),   # residual
            pl.BlockSpec((C, 1), lambda i: (0, 0)),           # bn2 shift
            pl.BlockSpec((C, Cr), lambda i: (0, 0)),          # fc1 weight^T
            pl.BlockSpec((Cr, C), lambda i: (0, 0)),          # fc2 weight^T
        ],
        out_specs=[
            pl.BlockSpec((tb, C, HW), lambda i: (i, 0, 0)),   # gated activations
            pl.BlockSpec((tb, C), lambda i: (i, 0)),          # SE gates y
        ],
        out_shape=(
            jax.ShapeDtypeStruct((B, C, HW), jnp.float32),
            jax.ShapeDtypeStruct((B, C), jnp.float32),
        ),
        # conv2's HBM output buffer is dead after this op: reuse it for out_x.
        input_output_aliases={0: 0},
        compiler_params=pltpu.CompilerParams(
            dimension_semantics=("parallel",),      # megacore sharding on v7x
            vmem_limit_bytes=vmem_limit,
        ),
    )(conv3, res3, bn_shift.reshape(C, 1), w1_t, w2_t)

    return out_x3.reshape(B, C, H, W), y


# ---------------------------------------------------------------------------
# Full CifarSE_POST_BasicBlock forward (inference-mode BatchNorm)
# ---------------------------------------------------------------------------
def _conv2d(x, w, stride, padding):
    # x: (B, Cin, H, W); w: (Cout, Cin, kh, kw) — PyTorch layouts.
    return jax.lax.conv_general_dilated(
        x, w, window_strides=(stride, stride),
        padding=((padding, padding), (padding, padding)),
        dimension_numbers=("NCHW", "OIHW", "NCHW"))


def _bn_fold(gamma, beta, mean, var, eps=1e-5):
    scale = gamma / jnp.sqrt(var + eps)
    return scale, beta - mean * scale


@partial(jax.jit, static_argnames=("stride", "max_batch_tile"))
def cifar_se_post_basic_block(x, params, stride=1, max_batch_tile=None):
    p = params

    # residual path (1x1 conv + bn if inplanes != planes, else identity)
    if "down_conv_w" in p:
        residual = _conv2d(x, p["down_conv_w"], stride, 0)
        ds, db = _bn_fold(p["down_gamma"], p["down_beta"],
                          p["down_mean"], p["down_var"])
        residual = residual * ds[None, :, None, None] + db[None, :, None, None]
    else:
        residual = x

    # conv1 -> bn1 -> relu -> conv2 (bn2 scale folded into conv2 weights)
    # TODO(synk): the 3x3 convolutions (and bn1) use XLA ops, not Pallas — a
    # dedicated Pallas conv kernel would not beat XLA's conv at these shapes.
    out = _conv2d(x, p["conv1_w"], stride, 1)
    s1, b1 = _bn_fold(p["bn1_gamma"], p["bn1_beta"], p["bn1_mean"], p["bn1_var"])
    out = jnp.maximum(out * s1[None, :, None, None] + b1[None, :, None, None], 0.0)
    s2, b2 = _bn_fold(p["bn2_gamma"], p["bn2_beta"], p["bn2_mean"], p["bn2_var"])
    out = _conv2d(out, p["conv2_w"] * s2[:, None, None, None], 1, 1)

    # fused Pallas kernel: bn2 shift + residual-add + relu + SE gate
    out_x, y = fused_bn_res_relu_se(out, residual, b2,
                                    p["se_w1_t"], p["se_w2_t"],
                                    max_batch_tile=max_batch_tile)

    # Route classifier in plain XLA (lane-sparse (B, 10) output; trivial cost).
    cls = y @ p["se_wc_t"] + p["se_bc"]
    return out_x, y, cls


# ---------------------------------------------------------------------------
# Pure-JAX reference mirroring the PyTorch forward
# ---------------------------------------------------------------------------
def cifar_se_post_basic_block_ref(x, params, stride=1):
    p = params
    if "down_conv_w" in p:
        residual = _conv2d(x, p["down_conv_w"], stride, 0)
        ds, db = _bn_fold(p["down_gamma"], p["down_beta"],
                          p["down_mean"], p["down_var"])
        residual = residual * ds[None, :, None, None] + db[None, :, None, None]
    else:
        residual = x
    out = _conv2d(x, p["conv1_w"], stride, 1)
    s1, b1 = _bn_fold(p["bn1_gamma"], p["bn1_beta"], p["bn1_mean"], p["bn1_var"])
    out = jnp.maximum(out * s1[None, :, None, None] + b1[None, :, None, None], 0.0)
    out = _conv2d(out, p["conv2_w"], 1, 1)
    s2, b2 = _bn_fold(p["bn2_gamma"], p["bn2_beta"], p["bn2_mean"], p["bn2_var"])
    out = jnp.maximum(out * s2[None, :, None, None] + b2[None, :, None, None]
                      + residual, 0.0)
    pooled = out.mean(axis=(2, 3))
    h = jnp.maximum(pooled @ p["se_w1_t"], 0.0)
    y = 1.0 / (1.0 + jnp.exp(-(h @ p["se_w2_t"])))
    cls = y @ p["se_wc_t"] + p["se_bc"]
    return out * y[:, :, None, None], y, cls


def _make_params(key, Cin, C, reduction=16, num_classes=10, downsample=False):
    Cr = max(1, C // reduction)
    ks = jax.random.split(key, 16)
    params = dict(
        conv1_w=jax.random.normal(ks[0], (C, Cin, 3, 3), jnp.float32) * 0.05,
        bn1_gamma=1.0 + 0.1 * jax.random.normal(ks[1], (C,), jnp.float32),
        bn1_beta=0.1 * jax.random.normal(ks[2], (C,), jnp.float32),
        bn1_mean=0.1 * jax.random.normal(ks[3], (C,), jnp.float32),
        bn1_var=1.0 + 0.1 * jnp.abs(jax.random.normal(ks[4], (C,), jnp.float32)),
        conv2_w=jax.random.normal(ks[5], (C, C, 3, 3), jnp.float32) * 0.05,
        bn2_gamma=1.0 + 0.1 * jax.random.normal(ks[6], (C,), jnp.float32),
        bn2_beta=0.1 * jax.random.normal(ks[7], (C,), jnp.float32),
        bn2_mean=0.1 * jax.random.normal(ks[8], (C,), jnp.float32),
        bn2_var=1.0 + 0.1 * jnp.abs(jax.random.normal(ks[9], (C,), jnp.float32)),
        se_w1_t=jax.random.normal(ks[10], (C, Cr), jnp.float32) * 0.1,   # fc[0].weight.T
        se_w2_t=jax.random.normal(ks[11], (Cr, C), jnp.float32) * 0.1,   # fc[2].weight.T
        se_wc_t=jax.random.normal(ks[12], (C, num_classes), jnp.float32) * 0.1,
        se_bc=jax.random.normal(ks[13], (num_classes,), jnp.float32) * 0.1,
    )
    if downsample:
        params.update(
            down_conv_w=jax.random.normal(ks[14], (C, Cin, 1, 1), jnp.float32) * 0.1,
            down_gamma=1.0 + 0.1 * jax.random.normal(ks[15], (C,), jnp.float32),
            down_beta=jnp.zeros((C,), jnp.float32),
            down_mean=jnp.zeros((C,), jnp.float32),
            down_var=jnp.ones((C,), jnp.float32),
        )
    return params


def _check(out, ref):
    for a, b in zip(out, ref):
        assert jnp.allclose(a, b, atol=1e-4, rtol=1e-4), (
            float(jnp.max(jnp.abs(a - b))))


if __name__ == "__main__":
    # CIFAR-like shapes: inplanes == planes == 32 (identity residual),
    # reduction=16 -> hidden=2, num_classes=10, 16x16 spatial -> HW=256.
    Cin, C, H, W = 32, 32, 16, 16
    key = jax.random.PRNGKey(0)
    kp, kx1, kx2, kx3, kx4 = jax.random.split(key, 5)
    params = _make_params(kp, Cin, C)

    # --- test 1: small batch, whole batch in a single block ---
    x = jax.random.normal(kx1, (2, Cin, H, W), jnp.float32)
    out = cifar_se_post_basic_block(x, params, stride=1)
    jax.block_until_ready(out)
    _check(out, cifar_se_post_basic_block_ref(x, params, stride=1))

    # --- test 2: larger batch, evenly tiled batch grid (3 steps of 8) ---
    x2 = jax.random.normal(kx2, (24, Cin, H, W), jnp.float32)
    out2 = cifar_se_post_basic_block(x2, params, stride=1, max_batch_tile=8)
    jax.block_until_ready(out2)
    _check(out2, cifar_se_post_basic_block_ref(x2, params, stride=1))

    # --- test 3: non-divisible batch, partial last block (no jnp.pad path) ---
    x3 = jax.random.normal(kx3, (10, Cin, H, W), jnp.float32)
    out3 = cifar_se_post_basic_block(x3, params, stride=1, max_batch_tile=8)
    jax.block_until_ready(out3)
    _check(out3, cifar_se_post_basic_block_ref(x3, params, stride=1))

    # --- test 4: downsample branch (inplanes != planes, stride 2) ---
    params_ds = _make_params(jax.random.PRNGKey(7), 16, C, downsample=True)
    x4 = jax.random.normal(kx4, (4, 16, H, W), jnp.float32)
    out4 = cifar_se_post_basic_block(x4, params_ds, stride=2)
    jax.block_until_ready(out4)
    _check(out4, cifar_se_post_basic_block_ref(x4, params_ds, stride=2))

    print("KERNEL_OK")
</pallas_src>

<mosaic_0001>
module attributes {stable_mosaic.version = 11 : i64} {
  func.func @_fused_bn_res_se_kernel(%arg0: i32, %arg1: memref<2x32x256xf32, #tpu.memory_space<vmem>>, %arg2: memref<2x32x256xf32, #tpu.memory_space<vmem>>, %arg3: memref<32x1xf32, #tpu.memory_space<vmem>>, %arg4: memref<32x2xf32, #tpu.memory_space<vmem>>, %arg5: memref<2x32xf32, #tpu.memory_space<vmem>>, %arg6: memref<2x32x256xf32, #tpu.memory_space<vmem>>, %arg7: memref<2x32xf32, #tpu.memory_space<vmem>>) attributes {dimension_semantics = [#tpu.dimension_semantics<parallel>], iteration_bounds = array<i64: 1>, scalar_prefetch = 0 : i64, scratch_operands = 0 : i64, tpu.core_type = #tpu.core_type<tc>, window_params = [{transform_indices = @transform_0, window_bounds = array<i64: 2, 32, 256>}, {transform_indices = @transform_1, window_bounds = array<i64: 2, 32, 256>}, {pipeline_mode = #tpu.pipeline_mode<synchronous>, transform_indices = @transform_2, window_bounds = array<i64: 32, 1>}, {pipeline_mode = #tpu.pipeline_mode<synchronous>, transform_indices = @transform_3, window_bounds = array<i64: 32, 2>}, {pipeline_mode = #tpu.pipeline_mode<synchronous>, transform_indices = @transform_4, window_bounds = array<i64: 2, 32>}, {transform_indices = @transform_5, window_bounds = array<i64: 2, 32, 256>}, {transform_indices = @transform_6, window_bounds = array<i64: 2, 32>}]} {
    %c0 = arith.constant 0 : index
    %c0_0 = arith.constant 0 : index
    %c0_1 = arith.constant 0 : index
    %0 = vector.load %arg1[%c0, %c0_0, %c0_1] : memref<2x32x256xf32, #tpu.memory_space<vmem>>, vector<2x32x256xf32>
    %c0_2 = arith.constant 0 : index
    %c0_3 = arith.constant 0 : index
    %1 = vector.load %arg3[%c0_2, %c0_3] : memref<32x1xf32, #tpu.memory_space<vmem>>, vector<32x1xf32>
    %2 = vector.shape_cast %1 : vector<32x1xf32> to vector<1x32x1xf32>
    %3 = vector.broadcast %2 : vector<1x32x1xf32> to vector<2x32x256xf32>
    %4 = arith.addf %0, %3 : vector<2x32x256xf32>
    %c0_4 = arith.constant 0 : index
    %c0_5 = arith.constant 0 : index
    %c0_6 = arith.constant 0 : index
    %5 = vector.load %arg2[%c0_4, %c0_5, %c0_6] : memref<2x32x256xf32, #tpu.memory_space<vmem>>, vector<2x32x256xf32>
    %6 = arith.addf %4, %5 : vector<2x32x256xf32>
    %cst = arith.constant 0.000000e+00 : f32
    %7 = vector.broadcast %cst : f32 to vector<2x32x256xf32>
    %8 = arith.maximumf %6, %7 : vector<2x32x256xf32>
    %c0_7 = arith.constant 0 : index
    %c0_8 = arith.constant 0 : index
    %c0_9 = arith.constant 0 : index
    %9 = vector.load %arg6[%c0_7, %c0_8, %c0_9] : memref<2x32x256xf32, #tpu.memory_space<vmem>>, vector<2x32x256xf32>
    tpu.vector_store %arg6[%c0_7, %c0_8, %c0_9], %8 {strides = array<i32>} : memref<2x32x256xf32, #tpu.memory_space<vmem>>, vector<2x32x256xf32>,
    %c0_10 = arith.constant 0 : index
    %c0_11 = arith.constant 0 : index
    %c0_12 = arith.constant 0 : index
    %10 = vector.load %arg6[%c0_10, %c0_11, %c0_12] : memref<2x32x256xf32, #tpu.memory_space<vmem>>, vector<2x32x256xf32>
    %cst_13 = arith.constant dense<0.000000e+00> : vector<2x32xf32>
    %11 = vector.multi_reduction <add>, %10, %cst_13 [2] : vector<2x32x256xf32> to vector<2x32xf32>
    %cst_14 = arith.constant 2.560000e+02 : f32
    %12 = vector.broadcast %cst_14 : f32 to vector<2x32xf32>
    %13 = arith.divf %11, %12 : vector<2x32xf32>
    %c0_15 = arith.constant 0 : index
    %c0_16 = arith.constant 0 : index
    %14 = vector.load %arg4[%c0_15, %c0_16] : memref<32x2xf32, #tpu.memory_space<vmem>>, vector<32x2xf32>
    %cst_17 = arith.constant dense<0.000000e+00> : vector<2x2xf32>
    %15 = tpu.matmul %13, %14, %cst_17 {dimension_numbers = #tpu.dot_dimension_numbers<[1], [0], [0], [1], [0, 0, 1, 1], [], []>} : vector<2x32xf32>, vector<32x2xf32>, vector<2x2xf32> -> vector<2x2xf32>
    %cst_18 = arith.constant 0.000000e+00 : f32
    %16 = vector.broadcast %cst_18 : f32 to vector<2x2xf32>
    %17 = arith.maximumf %15, %16 : vector<2x2xf32>
    %c0_19 = arith.constant 0 : index
    %c0_20 = arith.constant 0 : index
    %18 = vector.load %arg5[%c0_19, %c0_20] : memref<2x32xf32, #tpu.memory_space<vmem>>, vector<2x32xf32>
    %cst_21 = arith.constant dense<0.000000e+00> : vector<2x32xf32>
    %19 = tpu.matmul %17, %18, %cst_21 {dimension_numbers = #tpu.dot_dimension_numbers<[1], [0], [0], [1], [0, 0, 1, 1], [], []>} : vector<2x2xf32>, vector<2x32xf32>, vector<2x32xf32> -> vector<2x32xf32>
    %cst_22 = arith.constant 0.000000e+00 : f32
    %20 = vector.broadcast %cst_22 : f32 to vector<2x32xf32>
    %21 = arith.subf %20, %19 : vector<2x32xf32>
    %22 = math.exp %21 : vector<2x32xf32>
    %cst_23 = arith.constant 1.000000e+00 : f32
    %23 = vector.broadcast %cst_23 : f32 to vector<2x32xf32>
    %24 = arith.addf %23, %22 : vector<2x32xf32>
    %25 = tpu.reciprocal %24 : vector<2x32xf32> -> vector<2x32xf32>
    %c0_24 = arith.constant 0 : index
    %c0_25 = arith.constant 0 : index
    %26 = vector.load %arg7[%c0_24, %c0_25] : memref<2x32xf32, #tpu.memory_space<vmem>>, vector<2x32xf32>
    tpu.vector_store %arg7[%c0_24, %c0_25], %25 {strides = array<i32>} : memref<2x32xf32, #tpu.memory_space<vmem>>, vector<2x32xf32>,
    %c0_26 = arith.constant 0 : index
    %c0_27 = arith.constant 0 : index
    %c0_28 = arith.constant 0 : index
    %27 = vector.load %arg6[%c0_26, %c0_27, %c0_28] : memref<2x32x256xf32, #tpu.memory_space<vmem>>, vector<2x32x256xf32>
    %28 = vector.shape_cast %25 : vector<2x32xf32> to vector<2x32x1xf32>
    %29 = vector.broadcast %28 : vector<2x32x1xf32> to vector<2x32x256xf32>
    %30 = arith.mulf %27, %29 : vector<2x32x256xf32>
    %c0_29 = arith.constant 0 : index
    %c0_30 = arith.constant 0 : index
    %c0_31 = arith.constant 0 : index
    %31 = vector.load %arg6[%c0_29, %c0_30, %c0_31] : memref<2x32x256xf32, #tpu.memory_space<vmem>>, vector<2x32x256xf32>
    tpu.vector_store %arg6[%c0_29, %c0_30, %c0_31], %30 {strides = array<i32>} : memref<2x32x256xf32, #tpu.memory_space<vmem>>, vector<2x32x256xf32>,
    return
  }
  func.func @transform_0(%arg0: i32) -> (i32, i32, i32) {
    %c0_i32 = arith.constant 0 : i32
    %c0_i32_0 = arith.constant 0 : i32
    %c0_i32_1 = arith.constant 0 : i32
    return %arg0, %c0_i32, %c0_i32_0 : i32, i32, i32
  }
  func.func @transform_1(%arg0: i32) -> (i32, i32, i32) {
    %c0_i32 = arith.constant 0 : i32
    %c0_i32_0 = arith.constant 0 : i32
    %c0_i32_1 = arith.constant 0 : i32
    return %arg0, %c0_i32, %c0_i32_0 : i32, i32, i32
  }
  func.func @transform_2(%arg0: i32) -> (i32, i32) {
    %c0_i32 = arith.constant 0 : i32
    %c0_i32_0 = arith.constant 0 : i32
    %c0_i32_1 = arith.constant 0 : i32
    return %c0_i32, %c0_i32_0 : i32, i32
  }
  func.func @transform_3(%arg0: i32) -> (i32, i32) {
    %c0_i32 = arith.constant 0 : i32
    %c0_i32_0 = arith.constant 0 : i32
    %c0_i32_1 = arith.constant 0 : i32
    return %c0_i32, %c0_i32_0 : i32, i32
  }
  func.func @transform_4(%arg0: i32) -> (i32, i32) {
    %c0_i32 = arith.constant 0 : i32
    %c0_i32_0 = arith.constant 0 : i32
    %c0_i32_1 = arith.constant 0 : i32
    return %c0_i32, %c0_i32_0 : i32, i32
  }
  func.func @transform_5(%arg0: i32) -> (i32, i32, i32) {
    %c0_i32 = arith.constant 0 : i32
    %c0_i32_0 = arith.constant 0 : i32
    %c0_i32_1 = arith.constant 0 : i32
    return %arg0, %c0_i32, %c0_i32_0 : i32, i32, i32
  }
  func.func @transform_6(%arg0: i32) -> (i32, i32) {
    %c0_i32 = arith.constant 0 : i32
    %c0_i32_0 = arith.constant 0 : i32
    return %arg0, %c0_i32 : i32, i32
  }
}

</mosaic_0001>

<bundles_post_ra>
// kernel: cifar_se_post_basic_block.1
= control target key start
LH: loop header
LB: loop body
LE: loop exit
PB: predicated region body
PF: predicated region fallthrough
CT: control target
= control target key end

     0   :  { %v547_v0 = vmov 0   ;;  %vm549_vm0 = vmmov 0   ;;  %vm214_vm1 = vcmask 130112   ;;  %vm221_vm2 = vcmask 195712   ;;  %s880_s2 = inlined_call_operand.vmem [shape: f32[32,1], index: 2, kind: input, shape index: {}]   ;;  %s881_s0 = inlined_call_operand.vmem [shape: f32[2,32,256], index: 0, kind: input, shape index: {}, may-alias: {0,5}]   ;;  %s882_s1 = inlined_call_operand.vmem [shape: f32[2,32,256], index: 1, kind: input, shape index: {}]   ;;  %s883_s3 = inlined_call_operand.vmem [shape: f32[32,2], index: 3, kind: input, shape index: {}]   ;;  %s884_s4 = inlined_call_operand.vmem [shape: f32[2,32], index: 4, kind: input, shape index: {}]   ;;  %s885_s6 = inlined_call_operand.vmem [shape: f32[2,32], index: 6, kind: output, shape index: {1}]   ;;  %s886_s5 = inlined_call_operand.vmem [shape: f32[2,32,256], index: 5, kind: output, shape index: {0}, may-alias: {0,5}]  }
   0x1   :  { %541 = vset.pattern.permute.xlu0 %v547_v0  ;;  %v38_v1 = vld [vmem:[%s880_s2] sm:$0xff]  ;;  %542 = vset.pattern.permute.xlu1 %v547_v0  ;;  %v40_v2 = vld [vmem:[%s880_s2 + $0x10] sm:$0xff]  ;;  %v39_v3 = vld [vmem:[%s880_s2 + $0x8] sm:$0xff]  ;;  %vm228_vm3 = vcmask 261312   ;;  %vm249_vm4 = vcmask 1041409   ;;  %vm251_vm5 = vcmask 261120  }
   0x2   :  { %44 = vperm.xlu0 %541, %v38_v1   ;;  %54 = vperm.xlu1 %542, %v40_v2   ;;  %v41_v4 = vld [vmem:[%s880_s2 + $0x18] sm:$0xff]  ;;  %v22_v5 = vld [vmem:[%s881_s0] sm:$0xff]  ;;  %v23_v6 = vld [vmem:[%s881_s0 + $0x8] sm:$0xff]  ;;  %vm330_vm6 = vcmask 1041408   ;;  %vm326_vm7 = vcmask 15360   ;;  %vm409_vm8 = vcmask 254976  }
   0x3   :  { %v30_v7 = vld [vmem:[%s881_s0 + $0x40] sm:$0xff]  ;;  %v27_v9 = vld [vmem:[%s881_s0 + $0x28] sm:$0xff]  ;;  %v24_v18 = vld [vmem:[%s881_s0 + $0x10] sm:$0xff] }
   0x4   :  { %v26_v8 = vld [vmem:[%s881_s0 + $0x20] sm:$0xff]  ;;  %v31_v11 = vld [vmem:[%s881_s0 + $0x48] sm:$0xff]  ;;  %v25_v25 = vld [vmem:[%s881_s0 + $0x18] sm:$0xff] }
   0x5   :  { %v78_v12 = vld [vmem:[%s882_s1] sm:$0xff]  ;;  %v79_v13 = vld [vmem:[%s882_s1 + $0x8] sm:$0xff]  ;;  %v32_v30 = vld [vmem:[%s881_s0 + $0x50] sm:$0xff] }
   0x6   :  { %49 = vperm.xlu0 %541, %v39_v3   ;;  %59 = vperm.xlu1 %542, %v41_v4   ;;  %v86_v17 = vld [vmem:[%s882_s1 + $0x40] sm:$0xff]  ;;  %v83_v27 = vld [vmem:[%s882_s1 + $0x28] sm:$0xff]  ;;  %v33_v31 = vld [vmem:[%s881_s0 + $0x58] sm:$0xff] }
   0x7   :  { %v82_v26 = vld [vmem:[%s882_s1 + $0x20] sm:$0xff]  ;;  %v87_v28 = vld [vmem:[%s882_s1 + $0x48] sm:$0xff]  ;;  %v80_v32 = vld [vmem:[%s882_s1 + $0x10] sm:$0xff] }
   0x8   :  { %v81_v33 = vld [vmem:[%s882_s1 + $0x18] sm:$0xff]  ;;  %v34_v34 = vld [vmem:[%s881_s0 + $0x60] sm:$0xff]  ;;  %v35_v37 = vld [vmem:[%s881_s0 + $0x68] sm:$0xff] }
   0x9   :  { %v28_v41 = vld [vmem:[%s881_s0 + $0x30] sm:$0xff]  ;;  %v29_v42 = vld [vmem:[%s881_s0 + $0x38] sm:$0xff]  ;;  %v90_v61 = vld [vmem:[%s882_s1 + $0x60] sm:$0xff] }
   0xa   :  { %v84_v51 = vld [vmem:[%s882_s1 + $0x30] sm:$0xff]  ;;  %v85_v52 = vld [vmem:[%s882_s1 + $0x38] sm:$0xff]  ;;  %v91_v2 = vld [vmem:[%s882_s1 + $0x68] sm:$0xff] }
   0xb   :  { %v88_v53 = vld [vmem:[%s882_s1 + $0x50] sm:$0xff]  ;;  %v89_v54 = vld [vmem:[%s882_s1 + $0x58] sm:$0xff] }
  0x81   :  { %v45_v10 = vpop.permute.xlu0 %44  ;;  %v55_v14 = vpop.permute.xlu1 %54 }
  0x82   :  { %v62_v15 = vadd.f32 %v45_v10, %v22_v5  ;;  %v63_v16 = vadd.f32 %v45_v10, %v23_v6  ;;  %v66_v19 = vadd.f32 %v55_v14, %v26_v8  ;;  %v67_v20 = vadd.f32 %v55_v14, %v27_v9 }
  0x83   :  { %v70_v21 = vadd.f32 %v45_v10, %v30_v7  ;;  %v71_v22 = vadd.f32 %v45_v10, %v31_v11  ;;  %v74_v55 = vadd.f32 %v55_v14, %v34_v34  ;;  %v75_v56 = vadd.f32 %v55_v14, %v35_v37  ;;  %v36_v7 = vld [vmem:[%s881_s0 + $0x70] sm:$0xff]  ;;  %v37_v11 = vld [vmem:[%s881_s0 + $0x78] sm:$0xff] }
  0x84   :  { %v628_v23 = vadd.f32 %v78_v12, %v62_v15  ;;  %v630_v24 = vadd.f32 %v79_v13, %v63_v16  ;;  %v662_v38 = vadd.f32 %v82_v26, %v66_v19  ;;  %v664_v39 = vadd.f32 %v83_v27, %v67_v20 }
  0x85   :  { %v50_v29 = vpop.permute.xlu0 %49  ;;  %v60_v40 = vpop.permute.xlu1 %59  ;;  %v672_v43 = vadd.f32 %v86_v17, %v70_v21  ;;  %v674_v44 = vadd.f32 %v87_v28, %v71_v22  ;;  %v725_v10 = vadd.f32 %v90_v61, %v74_v55  ;;  %v730_v12 = vadd.f32 %v91_v2, %v75_v56  ;;  %v92_v21 = vld [vmem:[%s882_s1 + $0x70] sm:$0xff]  ;;  %v93_v22 = vld [vmem:[%s882_s1 + $0x78] sm:$0xff] }
  0x86   :  { %v64_v35 = vadd.f32 %v50_v29, %v24_v18  ;;  %v65_v36 = vadd.f32 %v50_v29, %v25_v25  ;;  %v110_v45 = vmax.f32 %v628_v23, 0.0  ;;  %v111_v46 = vmax.f32 %v630_v24, 0.0 }
  0x87   :  { %v72_v47 = vadd.f32 %v50_v29, %v32_v30  ;;  %v73_v48 = vadd.f32 %v50_v29, %v33_v31  ;;  %v68_v57 = vadd.f32 %v60_v40, %v28_v41  ;;  %v69_v58 = vadd.f32 %v60_v40, %v29_v42  ;;  %v193_v41 = vld [vmem:[%s883_s3 + $0x10] sm:$0xff]  ;;  %v194_v42 = vld [vmem:[%s883_s3 + $0x18] sm:$0xff] }
  0x88   :  { %v678_v49 = vadd.f32 %v80_v32, %v64_v35  ;;  %v680_v50 = vadd.f32 %v81_v33, %v65_v36  ;;  %v114_v62 = vmax.f32 %v662_v38, 0.0  ;;  %v115_v63 = vmax.f32 %v664_v39, 0.0  ;;  %v191_v35 = vld [vmem:[%s883_s3] sm:$0xff]  ;;  %v192_v36 = vld [vmem:[%s883_s3 + $0x8] sm:$0xff] }
  0x89   :  { %v118_v0 = vmax.f32 %v672_v43, 0.0  ;;  %v119_v1 = vmax.f32 %v674_v44, 0.0  ;;  %v706_v3 = vadd.f32 %v84_v51, %v68_v57  ;;  %v708_v4 = vadd.f32 %v85_v52, %v69_v58 }
  0x8a   :  { %v112_v59 = vmax.f32 %v678_v49, 0.0  ;;  %v113_v60 = vmax.f32 %v680_v50, 0.0  ;;  %v710_v5 = vadd.f32 %v88_v53, %v72_v47  ;;  %v712_v6 = vadd.f32 %v89_v54, %v73_v48 }
  0x8b   :  { %v158_v8 = vadd.f32 %v111_v46, %v110_v45  ;;  %v116_v13 = vmax.f32 %v706_v3, 0.0  ;;  %v117_v14 = vmax.f32 %v708_v4, 0.0  ;;  %v164_v15 = vadd.f32 %v115_v63, %v114_v62 }
  0x8c   :  { %v161_v9 = vadd.f32 %v113_v60, %v112_v59  ;;  %v76_v16 = vadd.f32 %v60_v40, %v36_v7  ;;  %v120_v17 = vmax.f32 %v710_v5, 0.0  ;;  %v121_v18 = vmax.f32 %v712_v6, 0.0 }
  0x8d   :  { %159 = vadd.xlane.f32.xlu0 %v158_v8  ;;  %v77_v19 = vadd.f32 %v60_v40, %v37_v11  ;;  %v170_v20 = vadd.f32 %v119_v1, %v118_v0  ;;  %v122_v25 = vmax.f32 %v725_v10, 0.0  ;;  %v123_v26 = vmax.f32 %v730_v12, 0.0 }
  0x8e   :  { %162 = vadd.xlane.f32.xlu1 %v161_v9  ;;  %v167_v27 = vadd.f32 %v117_v14, %v116_v13  ;;  %v756_v28 = vadd.f32 %v92_v21, %v76_v16  ;;  %v173_v30 = vadd.f32 %v121_v18, %v120_v17  ;;  %v532_v37 = vpack.c.bf16 %v192_v36, %v191_v35 }
  0x8f   :  { %v758_v29 = vadd.f32 %v93_v22, %v77_v19  ;;  %v176_v31 = vadd.f32 %v123_v26, %v122_v25  ;;  %v548_v40 = vmov 0.0|0.0   ;;  %v535_v47 = vpack.c.bf16 %v194_v42, %v193_v41 }
  0x90   :  { %v124_v32 = vmax.f32 %v756_v28, 0.0  ;;  %531 = vmatprep.subr.bf16.mxu0 %v548_v40  ;;  %v550_v48 = vmov 0.0   ;;  %v203_v53 = vlaneseq }
  0x91   :  { %171 = vadd.xlane.f32.xlu0 %v170_v20  ;;  %v125_v33 = vmax.f32 %v758_v29, 0.0  ;;  %533 = vmatpush3.bf16.msra.mxu0 %v532_v37 }
  0x92   :  { %165 = vadd.xlane.f32.xlu1 %v164_v15  ;;  %534 = vmatprep.subr.bf16.mxu0 %v548_v40  ;;  %v204_v56 = vand.u32 127, %v203_v53  ;;  %v786_v58 = vshrl.u32 %v203_v53, 7 }
  0x93   :  { %v179_v34 = vadd.f32 %v125_v33, %v124_v32  ;;  %523 = vmatprep.mubr.msk.f32.mxu0 %vm549_vm0, %v550_v48  ;;  %526 = vmatprep.subr.mxu1 %v550_v48 }
  0x94   :  { %528 = vmatprep.mubr.msk.f32.mxu1 %vm549_vm0, %v550_v48  ;;  %v209_v57 = vadd.s32 4294967288, %v204_v56  ;;  %v216_v61 = vadd.s32 4294967280, %v204_v56  ;;  %v223_v7 = vadd.s32 4294967272, %v204_v56  ;;  %v207_v16 = vsub.s32 %v204_v56, %v786_v58 }
  0x95   :  { %174 = vadd.xlane.f32.xlu0 %v173_v30  ;;  %536 = vmatpush3.bf16.msra.mxu0 %v535_v47 }
  0x96   :  { %168 = vadd.xlane.f32.xlu1 %v167_v27  ;;  %v212_v9 = vsub.s32 %v209_v57, %v786_v58  ;;  %v219_v19 = vsub.s32 %v216_v61, %v786_v58  ;;  %v226_v21 = vsub.s32 %v223_v7, %v786_v58  ;;  %v325_v7 = vld [vmem:[%s884_s4] sm:$0x3] }
  0x97   :  { %527 = vmatpush3.msk.msra.mxu1 %vm330_vm6, %v325_v7 }
  0x99   :  { %177 = vadd.xlane.f32.xlu0 %v176_v31 }
  0x9d   :  { %180 = vadd.xlane.f32.xlu0 %v179_v34 }
 0x11a   :  { %v160_v51 = vpop.xlane.xlu0 %159 }
 0x11b   :  { %v163_v52 = vpop.xlane.xlu1 %162  ;;  %v183_v27 = vmul.f32 0.00390625, %v160_v51 }
 0x11c   :  { %v184_v11 = vmul.f32 0.00390625, %v163_v52 }
 0x11d   :  { %v208_v42 = vrot.slane %v183_v27, %v207_v16  ;;  %v429_v27 = vsub.s32 0, %v786_v58 }
 0x11e   :  { %v172_v54 = vpop.xlane.xlu0 %171  ;;  %v213_v35 = vrot.slane %v184_v11, %v212_v9 }
 0x11f   :  { %v166_v55 = vpop.xlane.xlu1 %165  ;;  %v187_v30 = vmul.f32 0.00390625, %v172_v54 }
 0x120   :  { %v185_v20 = vmul.f32 0.00390625, %v166_v55  ;;  %v215_v53 = vsel %vm214_vm1, %v213_v35, %v208_v42 }
 0x121   :  { %v233_v47 = vrot.slane %v187_v30, %v207_v16 }
 0x122   :  { %v175_v2 = vpop.xlane.xlu0 %174  ;;  %v220_v37 = vrot.slane %v185_v20, %v219_v19 }
 0x123   :  { %v169_v8 = vpop.xlane.xlu1 %168  ;;  %v188_v15 = vmul.f32 0.00390625, %v175_v2 }
 0x124   :  { %v186_v31 = vmul.f32 0.00390625, %v169_v8  ;;  %v222_v51 = vsel %vm221_vm2, %v220_v37, %v215_v53 }
 0x125   :  { %v237_v36 = vrot.slane %v188_v15, %v212_v9 }
 0x126   :  { %v178_v22 = vpop.xlane.xlu0 %177  ;;  %v227_v48 = vrot.slane %v186_v31, %v226_v21 }
 0x127   :  { %v189_v34 = vmul.f32 0.00390625, %v178_v22  ;;  %v238_v55 = vsel %vm214_vm1, %v237_v36, %v233_v47 }
 0x128   :  { %v229_v57 = vsel %vm228_vm3, %v227_v48, %v222_v51 }
 0x129   :  { %v242_v40 = vrot.slane %v189_v34, %v219_v19  ;;  %v448_v34 = vsub.s32 1, %v786_v58 }
 0x12a   :  { %v181_v41 = vpop.xlane.xlu0 %180 }
 0x12b   :  { %v190_v52 = vmul.f32 0.00390625, %v181_v41  ;;  %v243_v54 = vsel %vm221_vm2, %v242_v40, %v238_v55 }
 0x12d   :  { %v247_v56 = vrot.slane %v190_v52, %v226_v21 }
 0x12f   :  { %v248_v61 = vsel %vm228_vm3, %v247_v56, %v243_v54 }
 0x130   :  { %v250_v2 = vsel %vm249_vm4, %v248_v61, %v229_v57 }
 0x131   :  { %524 = vmatmul.mubr.msk.f32.vlgmr.msra.gmra.mrb[0].mxu0 %vm251_vm5, %v250_v2 }
 0x204   :  { %v320_v8 = vpop.f32.mrb[0].mxu0 }
 0x205   :  { %v324_v9 = vmax.f32 %v320_v8, 0.0  ;;  %v525_v11 = vpop.f32.mrb[1].mxu0 }
 0x207   :  { %529 = vmatmul.mubr.msk.f32.vlgmr.msra.gmra.mrb[0].mxu1 %vm326_vm7, %v324_v9 }
 0x2da   :  { %v400_v15 = vpop.f32.mrb[0].mxu1 }
 0x2db   :  { %v404_v16 = vsub.f32 0.0, %v400_v15  ;;  %v530_v19 = vpop.f32.mrb[1].mxu1 }
 0x2dd   :  { %v405_v20 = vmul.f32 1.442695, %v404_v16 }
 0x2df   :  { %543 = vpow2.f32 %v405_v20 }
 0x2e9   :  { %v544_v21 = vpop.eup %543 }
 0x2ea   :  { %v407_v22 = vadd.f32 1.0, %v544_v21 }
 0x2ec   :  { %545 = vrcp.f32 %v407_v22 }
 0x2f6   :  { %v546_v30 = vpop.eup %545 }
 0x2f7   :  { %410 = vst.msk [vmem:[%s885_s6] sm:$0x3] %vm409_vm8, %v546_v30  ;;  %v430_v31 = vrot.slane %v546_v30, %v429_v27  ;;  %v449_v35 = vrot.slane %v546_v30, %v448_v34 }
 0x2f9   :  { %436 = vbcast.lane.b32.xlu0 %v430_v31, 264  ;;  %432 = vbcast.lane.b32.xlu1 %v430_v31, 256 }
 0x2fd   :  { %451 = vbcast.lane.b32.xlu0 %v449_v35, 256  ;;  %440 = vbcast.lane.b32.xlu1 %v430_v31, 272 }
 0x301   :  { %459 = vbcast.lane.b32.xlu0 %v449_v35, 272  ;;  %444 = vbcast.lane.b32.xlu1 %v430_v31, 280 }
 0x305   :  { %455 = vbcast.lane.b32.xlu1 %v449_v35, 264 }
 0x309   :  { %463 = vbcast.lane.b32.xlu1 %v449_v35, 280 }
 0x36b   :  { %v437_v36 = vpop.permute.xlu0 %436  ;;  %v433_v37 = vpop.permute.xlu1 %432 }
 0x36c   :  { %v467_v40 = vmul.f32 %v437_v36, %v112_v59  ;;  %v468_v41 = vmul.f32 %v437_v36, %v113_v60  ;;  %v465_v58 = vmul.f32 %v433_v37, %v110_v45  ;;  %v466_v42 = vmul.f32 %v433_v37, %v111_v46 }
 0x36e   :  { %483 = vst [vmem:[%s886_s5 + $0x10] sm:$0xff] %v467_v40  ;;  %484 = vst [vmem:[%s886_s5 + $0x18] sm:$0xff] %v468_v41 }
 0x36f   :  { %481 = vst [vmem:[%s886_s5] sm:$0xff] %v465_v58  ;;  %482 = vst [vmem:[%s886_s5 + $0x8] sm:$0xff] %v466_v42  ;;  %v452_v23 = vpop.permute.xlu0 %451  ;;  %v441_v45 = vpop.permute.xlu1 %440 }
 0x370   :  { %v473_v24 = vmul.f32 %v452_v23, %v118_v0  ;;  %v474_v46 = vmul.f32 %v452_v23, %v119_v1  ;;  %v469_v49 = vmul.f32 %v441_v45, %v114_v62  ;;  %v470_v50 = vmul.f32 %v441_v45, %v115_v63 }
 0x372   :  { %489 = vst [vmem:[%s886_s5 + $0x40] sm:$0xff] %v473_v24  ;;  %490 = vst [vmem:[%s886_s5 + $0x48] sm:$0xff] %v474_v46 }
 0x373   :  { %485 = vst [vmem:[%s886_s5 + $0x20] sm:$0xff] %v469_v49  ;;  %486 = vst [vmem:[%s886_s5 + $0x28] sm:$0xff] %v470_v50  ;;  %v460_v38 = vpop.permute.xlu0 %459  ;;  %v445_v43 = vpop.permute.xlu1 %444 }
 0x374   :  { %v477_v39 = vmul.f32 %v460_v38, %v122_v25  ;;  %v478_v44 = vmul.f32 %v460_v38, %v123_v26  ;;  %v471_v59 = vmul.f32 %v445_v43, %v116_v13  ;;  %v472_v60 = vmul.f32 %v445_v43, %v117_v14 }
 0x376   :  { %493 = vst [vmem:[%s886_s5 + $0x60] sm:$0xff] %v477_v39  ;;  %494 = vst [vmem:[%s886_s5 + $0x68] sm:$0xff] %v478_v44 }
 0x377   :  { %487 = vst [vmem:[%s886_s5 + $0x30] sm:$0xff] %v471_v59  ;;  %488 = vst [vmem:[%s886_s5 + $0x38] sm:$0xff] %v472_v60  ;;  %v456_v62 = vpop.permute.xlu1 %455 }
 0x378   :  { %v475_v63 = vmul.f32 %v456_v62, %v120_v17  ;;  %v476_v0 = vmul.f32 %v456_v62, %v121_v18 }
 0x37a   :  { %491 = vst [vmem:[%s886_s5 + $0x50] sm:$0xff] %v475_v63  ;;  %492 = vst [vmem:[%s886_s5 + $0x58] sm:$0xff] %v476_v0 }
 0x37b   :  { %v464_v1 = vpop.permute.xlu1 %463 }
 0x37c   :  { %v479_v3 = vmul.f32 %v464_v1, %v124_v32  ;;  %v480_v4 = vmul.f32 %v464_v1, %v125_v33 }
 0x37e   :  { %495 = vst [vmem:[%s886_s5 + $0x70] sm:$0xff] %v479_v3  ;;  %496 = vst [vmem:[%s886_s5 + $0x78] sm:$0xff] %v480_v4 }

</bundles_post_ra>
